<compile_context>
chip_gen: v6e
topology: v6e:2x2x1
jax: 0.10.0
libtpu: 0.0.40
codegen_flags: <defaults>
</compile_context>

<pallas_src>
import functools
import math

import jax
import jax.numpy as jnp
from jax.experimental import pallas as pl
from jax.experimental.pallas import tpu as pltpu

LANE = 128      # TPU vreg lane width
SUBLANE = 8     # f32 sublane count


def _round_up(x, m):
    return ((x + m - 1) // m) * m


# ----------------------------------------------------------------------------
# Kernel: one (batch tile, timestep) grid point, everything VMEM-resident.
# ----------------------------------------------------------------------------
def _rnn_agent_kernel(x_ref, h0_ref, w_ref, b_ref, q_ref, hout_ref,
                      *, inp_p, hid_p, act_p):
    """Grid = (batch_tiles, T); t = program_id(1) is the "arbitrary" time axis.

    x_ref:    (TB, inp_p)  f32   padded observation at timestep t
    h0_ref:   (TB, hid_p)  f32   initial hidden state (read only at t == 0)
    w_ref:    (R, 7*hid_p + act_p) bf16, R = max(inp_p, hid_p); column stripes
                [0, hid_p)                      = W1   (fc1)
                [hid_p, 4*hid_p)                = W_ih (r | z | n)
                [4*hid_p, 7*hid_p)              = W_hh (r | z | n)
                [7*hid_p, 7*hid_p + act_p)      = W2   (fc2)
    b_ref:    (1, 7*hid_p + act_p) f32, same stripe layout (b1|b_ih|b_hh|b2)
    q_ref:    (TB, act_p)  f32   per-step Q values
    hout_ref: (TB, hid_p)  f32   resident hidden-state carry / final output
    """
    t = pl.program_id(1)

    # Seed the resident VMEM hidden-state block at the first timestep of this
    # batch tile; for t > 0 it already holds h_{t-1}.
    @pl.when(t == 0)
    def _():
        hout_ref[...] = h0_ref[...]

    h = hout_ref[...]                                    # f32 (TB, hid_p)

    # Static, 128-aligned stripes of the packed buffers (free views).
    w1 = w_ref[0:inp_p, 0:hid_p]
    wih = w_ref[0:hid_p, hid_p:4 * hid_p]
    whh = w_ref[0:hid_p, 4 * hid_p:7 * hid_p]
    w2 = w_ref[0:hid_p, 7 * hid_p:7 * hid_p + act_p]

    b1 = b_ref[:, 0:hid_p]
    bih = b_ref[:, hid_p:4 * hid_p]
    bhh = b_ref[:, 4 * hid_p:7 * hid_p]
    b2 = b_ref[:, 7 * hid_p:7 * hid_p + act_p]

    # fc1 + ReLU (bf16 MXU inputs, f32 accumulate, f32 elementwise).
    x = x_ref[...].astype(jnp.bfloat16)
    x1 = jnp.maximum(
        jnp.dot(x, w1, preferred_element_type=jnp.float32) + b1, 0.0)

    # GRUCell (split gi/gh formulation; matches torch.nn.GRUCell exactly):
    #   r = sigmoid(gi_r + gh_r), z = sigmoid(gi_z + gh_z)
    #   n = tanh(gi_n + r * gh_n)      (b_hn stays inside r * (...))
    gi = jnp.dot(x1.astype(jnp.bfloat16), wih,
                 preferred_element_type=jnp.float32) + bih
    gh = jnp.dot(h.astype(jnp.bfloat16), whh,
                 preferred_element_type=jnp.float32) + bhh

    r = jax.nn.sigmoid(gi[:, 0:hid_p] + gh[:, 0:hid_p])
    z = jax.nn.sigmoid(gi[:, hid_p:2 * hid_p] + gh[:, hid_p:2 * hid_p])
    n = jnp.tanh(gi[:, 2 * hid_p:3 * hid_p] + r * gh[:, 2 * hid_p:3 * hid_p])
    h_new = (1.0 - z) * n + z * h

    # fc2
    q = jnp.dot(h_new.astype(jnp.bfloat16), w2,
                preferred_element_type=jnp.float32) + b2

    q_ref[...] = q.astype(q_ref.dtype)
    hout_ref[...] = h_new.astype(hout_ref.dtype)


# ----------------------------------------------------------------------------
# Wrappers
# ----------------------------------------------------------------------------
def _batch_tile(B, batch_tile):
    # >= 2 tiles whenever B >= 16 so the "parallel" batch axis can shard across
    # v7x's two TensorCores; sublane-aligned; capped by batch_tile.
    return min(batch_tile, max(SUBLANE, _round_up((B + 1) // 2, SUBLANE)))


def rnn_agent_rollout(x_seq, hidden_state, w_pack, b_pack, *,
                      input_shape, hidden_dim, n_actions, batch_tile=512):
    """Run T fused GRU steps in one kernel call.

    x_seq: (T, B, input_shape); hidden_state: (..., hidden_dim) with B rows.
    Returns (q_seq (T, B, n_actions), h_final (B, hidden_dim)).
    """
    T, B, F = x_seq.shape
    assert F == input_shape
    h0 = hidden_state.reshape(-1, hidden_dim).astype(jnp.float32)
    assert h0.shape[0] == B

    inp_p = _round_up(input_shape, LANE)
    hid_p = _round_up(hidden_dim, LANE)
    act_p = _round_up(n_actions, LANE)

    # Cheap feature-dim zero pad only; the batch dim is NOT padded (partial
    # last tile rows are independent garbage, their writes are masked).
    x_pad = jnp.pad(x_seq.astype(jnp.float32),
                    ((0, 0), (0, 0), (0, inp_p - input_shape)))
    h_pad = jnp.pad(h0, ((0, 0), (0, hid_p - hidden_dim)))

    tb = _batch_tile(B, batch_tile)
    nb = (B + tb - 1) // tb

    kernel = functools.partial(_rnn_agent_kernel,
                               inp_p=inp_p, hid_p=hid_p, act_p=act_p)

    q_pad, h_out = pl.pallas_call(
        kernel,
        out_shape=(
            jax.ShapeDtypeStruct((T, B, act_p), jnp.float32),
            jax.ShapeDtypeStruct((B, hid_p), jnp.float32),
        ),
        grid=(nb, T),
        in_specs=[
            pl.BlockSpec((None, tb, inp_p), lambda i, t: (t, i, 0)),
            pl.BlockSpec((tb, hid_p), lambda i, t: (i, 0)),
            pl.BlockSpec(w_pack.shape, lambda i, t: (0, 0)),   # resident
            pl.BlockSpec(b_pack.shape, lambda i, t: (0, 0)),   # resident
        ],
        out_specs=(
            pl.BlockSpec((None, tb, act_p), lambda i, t: (t, i, 0)),
            pl.BlockSpec((tb, hid_p), lambda i, t: (i, 0)),    # VMEM h carry
        ),
        input_output_aliases={1: 1},   # update hidden state in place
        compiler_params=pltpu.CompilerParams(
            dimension_semantics=("parallel", "arbitrary")),
    )(x_pad, h_pad, w_pack, b_pack)

    return q_pad[:, :, :n_actions], h_out[:, :hidden_dim]


def rnn_agent_forward(inputs, hidden_state, w_pack, b_pack, *,
                      input_shape, hidden_dim, n_actions, batch_tile=512):
    """Single GRU step == the PyTorch module's forward (T = 1 rollout)."""
    q_seq, h = rnn_agent_rollout(inputs[None], hidden_state, w_pack, b_pack,
                                 input_shape=input_shape, hidden_dim=hidden_dim,
                                 n_actions=n_actions, batch_tile=batch_tile)
    return q_seq[0], h


def init_hidden(hidden_dim, dtype=jnp.float32):
    return jnp.zeros((1, hidden_dim), dtype)


# ----------------------------------------------------------------------------
# Parameter init (PyTorch-style) and packing into the two kernel buffers
# ----------------------------------------------------------------------------
def init_params(key, input_shape, hidden_dim, n_actions):
    """PyTorch-style uniform init; weights stored transposed ([in, out])."""
    ks = jax.random.split(key, 10)

    def unif(k, shape, fan_in):
        bound = 1.0 / math.sqrt(fan_in)
        return jax.random.uniform(k, shape, jnp.float32, -bound, bound)

    return {
        "w1": unif(ks[0], (input_shape, hidden_dim), input_shape),
        "b1": unif(ks[1], (1, hidden_dim), input_shape),
        "w_ih": unif(ks[2], (hidden_dim, 3 * hidden_dim), hidden_dim),
        "b_ih": unif(ks[3], (1, 3 * hidden_dim), hidden_dim),
        "w_hh": unif(ks[4], (hidden_dim, 3 * hidden_dim), hidden_dim),
        "b_hh": unif(ks[5], (1, 3 * hidden_dim), hidden_dim),
        "w2": unif(ks[6], (hidden_dim, n_actions), hidden_dim),
        "b2": unif(ks[7], (1, n_actions), hidden_dim),
    }


def pack_params(params, input_shape, hidden_dim, n_actions):
    """Pack weights (bf16) and biases (f32) into two lane-padded buffers."""
    H = hidden_dim
    inp_p = _round_up(input_shape, LANE)
    hid_p = _round_up(H, LANE)
    act_p = _round_up(n_actions, LANE)

    rows = max(inp_p, hid_p)
    cols = 7 * hid_p + act_p

    w = jnp.zeros((rows, cols), jnp.float32)
    w = w.at[0:input_shape, 0:H].set(params["w1"])                       # W1
    for g in range(3):                                                   # r,z,n
        w = w.at[0:H, (1 + g) * hid_p:(1 + g) * hid_p + H].set(
            params["w_ih"][:, g * H:(g + 1) * H])                        # W_ih
        w = w.at[0:H, (4 + g) * hid_p:(4 + g) * hid_p + H].set(
            params["w_hh"][:, g * H:(g + 1) * H])                        # W_hh
    w = w.at[0:H, 7 * hid_p:7 * hid_p + n_actions].set(params["w2"])     # W2
    w_pack = w.astype(jnp.bfloat16)

    b = jnp.zeros((1, cols), jnp.float32)
    b = b.at[0, 0:H].set(params["b1"][0])
    for g in range(3):
        b = b.at[0, (1 + g) * hid_p:(1 + g) * hid_p + H].set(
            params["b_ih"][0, g * H:(g + 1) * H])
        b = b.at[0, (4 + g) * hid_p:(4 + g) * hid_p + H].set(
            params["b_hh"][0, g * H:(g + 1) * H])
    b = b.at[0, 7 * hid_p:7 * hid_p + n_actions].set(params["b2"][0])
    return w_pack, b


# ----------------------------------------------------------------------------
# Pure-JAX references (mirror the PyTorch forward)
# ----------------------------------------------------------------------------
def _bf(a):
    return a.astype(jnp.bfloat16).astype(jnp.float32)


def rnn_agent_reference(inputs, hidden_state, params, *, mixed=False):
    """mixed=True reproduces the kernel's bf16-weight / bf16-dot-input numerics
    (f32 accumulate, f32 elementwise); mixed=False is the pure-f32 forward."""
    cast = _bf if mixed else (lambda a: a)
    H = params["w1"].shape[1]
    h = hidden_state.reshape(-1, H).astype(jnp.float32)
    x1 = jax.nn.relu(cast(inputs.astype(jnp.float32)) @ cast(params["w1"])
                     + params["b1"])
    gi = cast(x1) @ cast(params["w_ih"]) + params["b_ih"]
    gh = cast(h) @ cast(params["w_hh"]) + params["b_hh"]
    i_r, i_z, i_n = jnp.split(gi, 3, axis=1)
    h_r, h_z, h_n = jnp.split(gh, 3, axis=1)
    r = jax.nn.sigmoid(i_r + h_r)
    z = jax.nn.sigmoid(i_z + h_z)
    n = jnp.tanh(i_n + r * h_n)
    h_new = (1.0 - z) * n + z * h
    q = cast(h_new) @ cast(params["w2"]) + params["b2"]
    return q, h_new


def rollout_reference(x_seq, hidden_state, params, *, mixed=False):
    H = params["w1"].shape[1]
    h = hidden_state.reshape(-1, H).astype(jnp.float32)
    qs = []
    for t in range(x_seq.shape[0]):
        q, h = rnn_agent_reference(x_seq[t], h, params, mixed=mixed)
        qs.append(q)
    return jnp.stack(qs, axis=0), h


if __name__ == "__main__":
    BATCH = 2
    INPUT_SHAPE = 48       # flat observation feature size
    HIDDEN = 32            # args.rnn_hidden_dim
    N_ACTIONS = 16
    T = 4                  # rollout length for the fused multi-step path

    key = jax.random.PRNGKey(0)
    k_params, k_x, k_h, k_seq = jax.random.split(key, 4)

    params = init_params(k_params, INPUT_SHAPE, HIDDEN, N_ACTIONS)
    w_pack, b_pack = pack_params(params, INPUT_SHAPE, HIDDEN, N_ACTIONS)

    inputs = jax.random.normal(k_x, (BATCH, INPUT_SHAPE), jnp.float32)
    hidden_state = 0.1 * jax.random.normal(k_h, (BATCH, 1, HIDDEN), jnp.float32)

    # ---- single GRU step (the module's forward) ----
    q, h = rnn_agent_forward(inputs, hidden_state, w_pack, b_pack,
                             input_shape=INPUT_SHAPE, hidden_dim=HIDDEN,
                             n_actions=N_ACTIONS)
    jax.block_until_ready((q, h))
    assert q.shape == (BATCH, N_ACTIONS) and h.shape == (BATCH, HIDDEN)

    q_mix, h_mix = rnn_agent_reference(inputs, hidden_state, params, mixed=True)
    assert jnp.allclose(q, q_mix, atol=1e-3, rtol=1e-3)
    assert jnp.allclose(h, h_mix, atol=1e-3, rtol=1e-3)
    # Semantic sanity vs. pure-f32 forward; slack covers bf16 weight quantization.
    q_f32, h_f32 = rnn_agent_reference(inputs, hidden_state, params, mixed=False)
    assert jnp.allclose(q, q_f32, atol=2e-1, rtol=1e-1)
    assert jnp.allclose(h, h_f32, atol=2e-1, rtol=1e-1)

    # ---- fused T-step rollout (weights DMA'd once for all steps) ----
    x_seq = jax.random.normal(k_seq, (T, BATCH, INPUT_SHAPE), jnp.float32)
    q_seq, h_T = rnn_agent_rollout(x_seq, hidden_state, w_pack, b_pack,
                                   input_shape=INPUT_SHAPE, hidden_dim=HIDDEN,
                                   n_actions=N_ACTIONS)
    jax.block_until_ready((q_seq, h_T))
    assert q_seq.shape == (T, BATCH, N_ACTIONS) and h_T.shape == (BATCH, HIDDEN)

    q_seq_mix, h_T_mix = rollout_reference(x_seq, hidden_state, params, mixed=True)
    assert jnp.allclose(q_seq, q_seq_mix, atol=2e-3, rtol=2e-3)
    assert jnp.allclose(h_T, h_T_mix, atol=2e-3, rtol=2e-3)

    print("KERNEL_OK")
</pallas_src>

<mosaic_0001>
module attributes {stable_mosaic.version = 11 : i64} {
  func.func @_rnn_agent_kernel(%arg0: i32, %arg1: i32, %arg2: memref<1x8x128xf32, #tpu.memory_space<vmem>>, %arg3: memref<8x128xf32, #tpu.memory_space<vmem>>, %arg4: memref<128x1024xbf16, #tpu.memory_space<vmem>>, %arg5: memref<1x1024xf32, #tpu.memory_space<vmem>>, %arg6: memref<1x8x128xf32, #tpu.memory_space<vmem>>, %arg7: memref<8x128xf32, #tpu.memory_space<vmem>>) attributes {dimension_semantics = [#tpu.dimension_semantics<parallel>, #tpu.dimension_semantics<arbitrary>], iteration_bounds = array<i64: 1, 1>, scalar_prefetch = 0 : i64, scratch_operands = 0 : i64, tpu.core_type = #tpu.core_type<tc>, window_params = [{transform_indices = @transform_0, window_bounds = array<i64: 1, 8, 128>}, {transform_indices = @transform_1, window_bounds = array<i64: 8, 128>}, {pipeline_mode = #tpu.pipeline_mode<synchronous>, transform_indices = @transform_2, window_bounds = array<i64: 128, 1024>}, {pipeline_mode = #tpu.pipeline_mode<synchronous>, transform_indices = @transform_3, window_bounds = array<i64: 1, 1024>}, {transform_indices = @transform_4, window_bounds = array<i64: 1, 8, 128>}, {transform_indices = @transform_5, window_bounds = array<i64: 8, 128>}]} {
    %c0_i32 = arith.constant 0 : i32
    %0 = arith.cmpi eq, %arg1, %c0_i32 : i32
    %1 = arith.extui %0 : i1 to i32
    %c0_i32_0 = arith.constant 0 : i32
    %2 = arith.cmpi ne, %1, %c0_i32_0 : i32
    scf.if %2 {
      %c0_30 = arith.constant 0 : index
      %c0_31 = arith.constant 0 : index
      %62 = vector.load %arg3[%c0_30, %c0_31] : memref<8x128xf32, #tpu.memory_space<vmem>>, vector<8x128xf32>
      %c0_32 = arith.constant 0 : index
      %c0_33 = arith.constant 0 : index
      %63 = vector.load %arg7[%c0_32, %c0_33] : memref<8x128xf32, #tpu.memory_space<vmem>>, vector<8x128xf32>
      tpu.vector_store %arg7[%c0_32, %c0_33], %62 {strides = array<i32>} : memref<8x128xf32, #tpu.memory_space<vmem>>, vector<8x128xf32>,
    } else {
    }
    %c0 = arith.constant 0 : index
    %c0_1 = arith.constant 0 : index
    %3 = vector.load %arg7[%c0, %c0_1] : memref<8x128xf32, #tpu.memory_space<vmem>>, vector<8x128xf32>
    %c0_2 = arith.constant 0 : index
    %c0_3 = arith.constant 0 : index
    %4 = vector.load %arg4[%c0_2, %c0_3] : memref<128x1024xbf16, #tpu.memory_space<vmem>>, vector<128x128xbf16>
    %c0_4 = arith.constant 0 : index
    %c128 = arith.constant 128 : index
    %5 = vector.load %arg4[%c0_4, %c128] : memref<128x1024xbf16, #tpu.memory_space<vmem>>, vector<128x384xbf16>
    %c0_5 = arith.constant 0 : index
    %c512 = arith.constant 512 : index
    %6 = vector.load %arg4[%c0_5, %c512] : memref<128x1024xbf16, #tpu.memory_space<vmem>>, vector<128x384xbf16>
    %c0_6 = arith.constant 0 : index
    %c896 = arith.constant 896 : index
    %7 = vector.load %arg4[%c0_6, %c896] : memref<128x1024xbf16, #tpu.memory_space<vmem>>, vector<128x128xbf16>
    %c0_7 = arith.constant 0 : index
    %c0_8 = arith.constant 0 : index
    %8 = vector.load %arg5[%c0_7, %c0_8] : memref<1x1024xf32, #tpu.memory_space<vmem>>, vector<1x128xf32>
    %c0_9 = arith.constant 0 : index
    %c128_10 = arith.constant 128 : index
    %9 = vector.load %arg5[%c0_9, %c128_10] : memref<1x1024xf32, #tpu.memory_space<vmem>>, vector<1x384xf32>
    %c0_11 = arith.constant 0 : index
    %c512_12 = arith.constant 512 : index
    %10 = vector.load %arg5[%c0_11, %c512_12] : memref<1x1024xf32, #tpu.memory_space<vmem>>, vector<1x384xf32>
    %c0_13 = arith.constant 0 : index
    %c896_14 = arith.constant 896 : index
    %11 = vector.load %arg5[%c0_13, %c896_14] : memref<1x1024xf32, #tpu.memory_space<vmem>>, vector<1x128xf32>
    %c0_15 = arith.constant 0 : index
    %c0_16 = arith.constant 0 : index
    %c0_17 = arith.constant 0 : index
    %12 = vector.load %arg2[%c0_15, %c0_16, %c0_17] : memref<1x8x128xf32, #tpu.memory_space<vmem>>, vector<1x8x128xf32>
    %13 = vector.shape_cast %12 : vector<1x8x128xf32> to vector<8x128xf32>
    %14 = arith.truncf %13 : vector<8x128xf32> to vector<8x128xbf16>
    %cst = arith.constant dense<0.000000e+00> : vector<8x128xf32>
    %15 = tpu.matmul %14, %4, %cst {dimension_numbers = #tpu.dot_dimension_numbers<[1], [0], [0], [1], [0, 0, 1, 1], [], []>} : vector<8x128xbf16>, vector<128x128xbf16>, vector<8x128xf32> -> vector<8x128xf32>
    %16 = vector.broadcast %8 : vector<1x128xf32> to vector<8x128xf32>
    %17 = arith.addf %15, %16 : vector<8x128xf32>
    %cst_18 = arith.constant 0.000000e+00 : f32
    %18 = vector.broadcast %cst_18 : f32 to vector<8x128xf32>
    %19 = arith.maximumf %17, %18 : vector<8x128xf32>
    %20 = arith.truncf %19 : vector<8x128xf32> to vector<8x128xbf16>
    %cst_19 = arith.constant dense<0.000000e+00> : vector<8x384xf32>
    %21 = tpu.matmul %20, %5, %cst_19 {dimension_numbers = #tpu.dot_dimension_numbers<[1], [0], [0], [1], [0, 0, 1, 1], [], []>} : vector<8x128xbf16>, vector<128x384xbf16>, vector<8x384xf32> -> vector<8x384xf32>
    %22 = vector.broadcast %9 : vector<1x384xf32> to vector<8x384xf32>
    %23 = arith.addf %21, %22 : vector<8x384xf32>
    %24 = arith.truncf %3 : vector<8x128xf32> to vector<8x128xbf16>
    %cst_20 = arith.constant dense<0.000000e+00> : vector<8x384xf32>
    %25 = tpu.matmul %24, %6, %cst_20 {dimension_numbers = #tpu.dot_dimension_numbers<[1], [0], [0], [1], [0, 0, 1, 1], [], []>} : vector<8x128xbf16>, vector<128x384xbf16>, vector<8x384xf32> -> vector<8x384xf32>
    %26 = vector.broadcast %10 : vector<1x384xf32> to vector<8x384xf32>
    %27 = arith.addf %25, %26 : vector<8x384xf32>
    %28 = vector.extract_strided_slice %23 {offsets = [0, 0], sizes = [8, 128], strides = [1, 1]} : vector<8x384xf32> to vector<8x128xf32>
    %29 = vector.extract_strided_slice %27 {offsets = [0, 0], sizes = [8, 128], strides = [1, 1]} : vector<8x384xf32> to vector<8x128xf32>
    %30 = arith.addf %28, %29 : vector<8x128xf32>
    %31 = arith.negf %30 : vector<8x128xf32>
    %32 = math.exp %31 : vector<8x128xf32>
    %cst_21 = arith.constant 1.000000e+00 : f32
    %33 = vector.broadcast %cst_21 : f32 to vector<8x128xf32>
    %34 = arith.addf %33, %32 : vector<8x128xf32>
    %35 = arith.divf %33, %34 : vector<8x128xf32>
    %36 = vector.extract_strided_slice %23 {offsets = [0, 128], sizes = [8, 128], strides = [1, 1]} : vector<8x384xf32> to vector<8x128xf32>
    %37 = vector.extract_strided_slice %27 {offsets = [0, 128], sizes = [8, 128], strides = [1, 1]} : vector<8x384xf32> to vector<8x128xf32>
    %38 = arith.addf %36, %37 : vector<8x128xf32>
    %39 = arith.negf %38 : vector<8x128xf32>
    %40 = math.exp %39 : vector<8x128xf32>
    %cst_22 = arith.constant 1.000000e+00 : f32
    %41 = vector.broadcast %cst_22 : f32 to vector<8x128xf32>
    %42 = arith.addf %41, %40 : vector<8x128xf32>
    %43 = arith.divf %41, %42 : vector<8x128xf32>
    %44 = vector.extract_strided_slice %23 {offsets = [0, 256], sizes = [8, 128], strides = [1, 1]} : vector<8x384xf32> to vector<8x128xf32>
    %45 = vector.extract_strided_slice %27 {offsets = [0, 256], sizes = [8, 128], strides = [1, 1]} : vector<8x384xf32> to vector<8x128xf32>
    %46 = arith.mulf %35, %45 : vector<8x128xf32>
    %47 = arith.addf %44, %46 : vector<8x128xf32>
    %48 = math.tanh %47 : vector<8x128xf32>
    %cst_23 = arith.constant 1.000000e+00 : f32
    %49 = vector.broadcast %cst_23 : f32 to vector<8x128xf32>
    %50 = arith.subf %49, %43 : vector<8x128xf32>
    %51 = arith.mulf %50, %48 : vector<8x128xf32>
    %52 = arith.mulf %43, %3 : vector<8x128xf32>
    %53 = arith.addf %51, %52 : vector<8x128xf32>
    %54 = arith.truncf %53 : vector<8x128xf32> to vector<8x128xbf16>
    %cst_24 = arith.constant dense<0.000000e+00> : vector<8x128xf32>
    %55 = tpu.matmul %54, %7, %cst_24 {dimension_numbers = #tpu.dot_dimension_numbers<[1], [0], [0], [1], [0, 0, 1, 1], [], []>} : vector<8x128xbf16>, vector<128x128xbf16>, vector<8x128xf32> -> vector<8x128xf32>
    %56 = vector.broadcast %11 : vector<1x128xf32> to vector<8x128xf32>
    %57 = arith.addf %55, %56 : vector<8x128xf32>
    %c0_25 = arith.constant 0 : index
    %c0_26 = arith.constant 0 : index
    %c0_27 = arith.constant 0 : index
    %58 = vector.load %arg6[%c0_25, %c0_26, %c0_27] : memref<1x8x128xf32, #tpu.memory_space<vmem>>, vector<1x8x128xf32>
    %59 = vector.shape_cast %58 : vector<1x8x128xf32> to vector<8x128xf32>
    %60 = vector.shape_cast %57 : vector<8x128xf32> to vector<1x8x128xf32>
    tpu.vector_store %arg6[%c0_25, %c0_26, %c0_27], %60 {strides = array<i32>} : memref<1x8x128xf32, #tpu.memory_space<vmem>>, vector<1x8x128xf32>,
    %c0_28 = arith.constant 0 : index
    %c0_29 = arith.constant 0 : index
    %61 = vector.load %arg7[%c0_28, %c0_29] : memref<8x128xf32, #tpu.memory_space<vmem>>, vector<8x128xf32>
    tpu.vector_store %arg7[%c0_28, %c0_29], %53 {strides = array<i32>} : memref<8x128xf32, #tpu.memory_space<vmem>>, vector<8x128xf32>,
    return
  }
  func.func @transform_0(%arg0: i32, %arg1: i32) -> (i32, i32, i32) {
    %c0_i32 = arith.constant 0 : i32
    %c0_i32_0 = arith.constant 0 : i32
    return %arg1, %arg0, %c0_i32 : i32, i32, i32
  }
  func.func @transform_1(%arg0: i32, %arg1: i32) -> (i32, i32) {
    %c0_i32 = arith.constant 0 : i32
    %c0_i32_0 = arith.constant 0 : i32
    return %arg0, %c0_i32 : i32, i32
  }
  func.func @transform_2(%arg0: i32, %arg1: i32) -> (i32, i32) {
    %c0_i32 = arith.constant 0 : i32
    %c0_i32_0 = arith.constant 0 : i32
    %c0_i32_1 = arith.constant 0 : i32
    return %c0_i32, %c0_i32_0 : i32, i32
  }
  func.func @transform_3(%arg0: i32, %arg1: i32) -> (i32, i32) {
    %c0_i32 = arith.constant 0 : i32
    %c0_i32_0 = arith.constant 0 : i32
    %c0_i32_1 = arith.constant 0 : i32
    return %c0_i32, %c0_i32_0 : i32, i32
  }
  func.func @transform_4(%arg0: i32, %arg1: i32) -> (i32, i32, i32) {
    %c0_i32 = arith.constant 0 : i32
    %c0_i32_0 = arith.constant 0 : i32
    return %arg1, %arg0, %c0_i32 : i32, i32, i32
  }
  func.func @transform_5(%arg0: i32, %arg1: i32) -> (i32, i32) {
    %c0_i32 = arith.constant 0 : i32
    %c0_i32_0 = arith.constant 0 : i32
    return %arg0, %c0_i32 : i32, i32
  }
}

</mosaic_0001>

<bundles_post_ra>
// kernel: tpu_custom_call.1
= control target key start
LH: loop header
LB: loop body
LE: loop exit
PB: predicated region body
PF: predicated region fallthrough
CT: control target
= control target key end

     0   :  { %11 = vsyncpa [#allocation3], 0  ;;  %s1296_s0 = inlined_call_operand.vmem [shape: f32[1,2,128], index: 0, kind: input, shape index: {}]   ;;  %s1297_s1 = inlined_call_operand.hbm [shape: f32[2,128], index: 1, kind: input, shape index: {}, may-alias: {1,5}]   ;;  %s1298_s2 = inlined_call_operand.hbm [shape: bf16[128,1024], index: 2, kind: input, shape index: {}]   ;;  %s1299_s3 = inlined_call_operand.hbm [shape: f32[1,1024], index: 3, kind: input, shape index: {}]   ;;  %s1300_s4 = inlined_call_operand.hbm [shape: f32[1,2,128], index: 4, kind: output, shape index: {0}]   ;;  %s1301_s5 = inlined_call_operand.hbm [shape: f32[2,128], index: 5, kind: output, shape index: {1}, may-alias: {1,5}]  }
   0x1   :  { %12 = vsyncpa [#allocation6], 0 }
   0x2   :  { %13 = vsyncpa [#allocation4], 0 }
   0x3   :  { %14 = vsyncpa [#allocation10], 0 }
   0x4   :  { %21 = vsyncadd [#allocation3], 96  ;;  %s1182_s18 = smov [#allocation5]  }
   0x5   :  { %s34_s19 = sshll.u32 %s1182_s18, 4  ;;  %s35_s19 = int_to_ptr.vmem [resolvable:$true] %s34_s19 }
   0x6   :  { %s1082_s20 = scalar_lea.vmem %s35_s19, 8192  ;;  %p1087_p1 = scmp.lt.s32.totalorder %s35_s19, %s35_s19 }
   0x7   :  { %p1083_p0 = scmp.ne.s32.totalorder %s35_s19, %s1082_s20  ;;  %p1088_p2 = scmp.lt.s32.totalorder %s1082_s20, %s1082_s20 }
   0x9   :  { %p1089_p3 = por %p1088_p2, %p1087_p1 }
   0xb   :  { %p1090_p4 = pnand %p1089_p3, %p1083_p0 }
   0xd   :  { %1093 = shalt.err (!%p1090_p4)
}
   0xe   :  { %s1183_s21 = smov 512   ;;  %s1184_s22 = smov 32  }
   0xf   :  { %40 = dma.hbm_to_vmem [thread:$0]  %s1298_s2, 8192, %s35_s19, [#allocation6], %s1183_s21, %s1183_s21, %s1184_s22  }
  0x10   :  { %s1185_s25 = smov [#allocation2]  }
  0x11   :  { %s22_s26 = sshll.u32 %s1185_s25, 4  ;;  %s23_s26 = int_to_ptr.vmem [resolvable:$true] %s22_s26 }
  0x12   :  { %s1102_s27 = scalar_lea.vmem %s23_s26, 32  ;;  %s1106_s28 = scalar_lea.vmem %s23_s26, 128 }
  0x13   :  { %p1103_p5 = scmp.ne.s32.totalorder %s23_s26, %s1102_s27  ;;  %p1107_p6 = scmp.lt.s32.totalorder %s23_s26, %s23_s26 }
  0x14   :  { %p1108_p7 = scmp.lt.s32.totalorder %s1106_s28, %s1102_s27 }
  0x16   :  { %p1109_p8 = por %p1108_p7, %p1107_p6 }
  0x18   :  { %p1110_p9 = pnand %p1109_p8, %p1103_p5 }
  0x1a   :  { %1113 = shalt.err (!%p1110_p9)
}
  0x1b   :  { %s1186_s29 = smov 2   ;;  %s1187_s2 = smov [#allocation7]  }
  0x1c   :  { %28 = dma.hbm_to_vmem [thread:$0]  %s1297_s1, 32, %s23_s26, [#allocation3], %s1184_s22, %s1184_s22, %s1186_s29  }
  0x1d   :  { %s47_s7 = sshll.u32 %s1187_s2, 4  ;;  %s48_s7 = int_to_ptr.vmem [resolvable:$true] %s47_s7 }
  0x1e   :  { %s1122_s8 = scalar_lea.vmem %s48_s7, 128  ;;  %p1127_p11 = scmp.lt.s32.totalorder %s48_s7, %s48_s7 }
  0x1f   :  { %p1123_p10 = scmp.ne.s32.totalorder %s48_s7, %s1122_s8  ;;  %p1128_p12 = scmp.lt.s32.totalorder %s1122_s8, %s1122_s8 }
  0x21   :  { %p1129_p13 = por %p1128_p12, %p1127_p11 }
  0x23   :  { %p1130_p0 = pnand %p1129_p13, %p1123_p10 }
  0x25   :  { %1133 = shalt.err (!%p1130_p0)
}
  0x26   :  { %50 = dma.hbm_to_vmem [thread:$0]  %s1299_s3, 128, %s48_s7, [#allocation6]  }
  0x27   :  { %1174 = dma.done.wait [#allocation3], 128  }
  0x28   :  { %1175 = vsyncadd [#allocation3], 4294967168 }
  0x29   :  { %1176 = dma.done.wait [#allocation6], 8320  }
  0x2a   :  { %1177 = vsyncadd [#allocation6], 4294958976  ;;  %v1188_v0 = vmov 0.0   ;;  %vm1189_vm0 = vmmov 0   ;;  %v82_v1 = vld [vmem:[#allocation5 + $0x1c0] sm:$0xf] }
  0x2b   :  { %973 = vmatprep.subr.bf16.mxu0 %v1188_v0  ;;  %989 = vmatprep.mubr.msk.bf16.mxu0 %vm1189_vm0, %v1188_v0  ;;  %v83_v2 = vld [vmem:[#allocation5 + $0x1e0] sm:$0xf]  ;;  %v112_v9 = vld [vmem:[#allocation5 + $0x1c4] sm:$0xff]  ;;  %v168_v51 = vld [vmem:[%s1296_s0] sm:$0xff] }
  0x2c   :  { %v80_v3 = vld [vmem:[#allocation5 + $0x180] sm:$0xf]  ;;  %v877_v4 = vcombine.low %v82_v1, %v83_v2  ;;  %v114_v10 = vld [vmem:[#allocation5 + $0x1e4] sm:$0xff]  ;;  %v113_v53 = vld [vmem:[#allocation5 + $0x1cc] sm:$0xf]  ;;  %v169_v55 = vpack.c.bf16 %v168_v51, %v168_v51 }
  0x2d   :  { %v81_v5 = vld [vmem:[#allocation5 + $0x1a0] sm:$0xf]  ;;  %v900_v13 = vcombine.high %v112_v9, %v114_v10  ;;  %v899_v14 = vcombine.low %v112_v9, %v114_v10  ;;  %v108_v15 = vld [vmem:[#allocation5 + $0x184] sm:$0xff]  ;;  %v115_v54 = vld [vmem:[#allocation5 + $0x1ec] sm:$0xf] }
  0x2e   :  { %974 = vmatpush3.bf16.msra.mxu0 %v877_v4  ;;  %v876_v6 = vcombine.low %v80_v3, %v81_v5  ;;  %v78_v7 = vld [vmem:[#allocation5 + $0x140] sm:$0xf]  ;;  %v110_v16 = vld [vmem:[#allocation5 + $0x1a4] sm:$0xff]  ;;  %v901_v57 = vcombine.low %v113_v53, %v115_v54  ;;  %v109_v58 = vld [vmem:[#allocation5 + $0x18c] sm:$0xf] }
  0x2f   :  { %975 = vmatprep.subr.bf16.mxu0 %v1188_v0  ;;  %v79_v8 = vld [vmem:[#allocation5 + $0x160] sm:$0xf]  ;;  %v897_v18 = vcombine.high %v108_v15, %v110_v16  ;;  %v104_v19 = vld [vmem:[#allocation5 + $0x144] sm:$0xff]  ;;  %410 = vmatprep.subr.bf16.mxu1 %v900_v13  ;;  %v896_v21 = vcombine.low %v108_v15, %v110_v16  ;;  %v111_v59 = vld [vmem:[#allocation5 + $0x1ac] sm:$0xf] }
  0x30   :  { %v875_v11 = vcombine.low %v78_v7, %v79_v8  ;;  %v76_v12 = vld [vmem:[#allocation5 + $0x100] sm:$0xf]  ;;  %v106_v20 = vld [vmem:[#allocation5 + $0x164] sm:$0xff]  ;;  %411 = vmatpush1.bf16.msra.mxu1 %v899_v14  ;;  %v898_v60 = vcombine.low %v109_v58, %v111_v59  ;;  %v105_v61 = vld [vmem:[#allocation5 + $0x14c] sm:$0xf] }
  0x31   :  { %v77_v17 = vld [vmem:[#allocation5 + $0x120] sm:$0xf]  ;;  %412 = vmatprep.subr.bf16.mxu1 %v897_v18  ;;  %v894_v24 = vcombine.high %v104_v19, %v106_v20  ;;  %v100_v26 = vld [vmem:[#allocation5 + $0x104] sm:$0xff]  ;;  %v893_v28 = vcombine.low %v104_v19, %v106_v20  ;;  %v107_v62 = vld [vmem:[#allocation5 + $0x16c] sm:$0xf] }
  0x32   :  { %976 = vmatpush3.bf16.msra.mxu0 %v876_v6  ;;  %v874_v22 = vcombine.low %v76_v12, %v77_v17  ;;  %v74_v23 = vld [vmem:[#allocation5 + $0xc0] sm:$0xf]  ;;  %v102_v27 = vld [vmem:[#allocation5 + $0x124] sm:$0xff]  ;;  %v895_v63 = vcombine.low %v105_v61, %v107_v62  ;;  %v101_v1 = vld [vmem:[#allocation5 + $0x10c] sm:$0xf] }
  0x33   :  { %977 = vmatprep.subr.bf16.mxu0 %v1188_v0  ;;  %v75_v25 = vld [vmem:[#allocation5 + $0xe0] sm:$0xf]  ;;  %v891_v31 = vcombine.high %v100_v26, %v102_v27  ;;  %v96_v33 = vld [vmem:[#allocation5 + $0xc4] sm:$0xff]  ;;  %v890_v35 = vcombine.low %v100_v26, %v102_v27  ;;  %v103_v2 = vld [vmem:[#allocation5 + $0x12c] sm:$0xf] }
  0x34   :  { %413 = vmatpush1.bf16.msra.mxu1 %v896_v21  ;;  %v873_v29 = vcombine.low %v74_v23, %v75_v25  ;;  %v72_v30 = vld [vmem:[#allocation5 + $0x80] sm:$0xf]  ;;  %v98_v34 = vld [vmem:[#allocation5 + $0xe4] sm:$0xff]  ;;  %v892_v3 = vcombine.low %v101_v1, %v103_v2  ;;  %v97_v4 = vld [vmem:[#allocation5 + $0xcc] sm:$0xf] }
  0x35   :  { %414 = vmatprep.subr.bf16.mxu1 %v894_v24  ;;  %v73_v32 = vld [vmem:[#allocation5 + $0xa0] sm:$0xf]  ;;  %v888_v38 = vcombine.high %v96_v33, %v98_v34  ;;  %v92_v40 = vld [vmem:[#allocation5 + $0x84] sm:$0xff]  ;;  %v887_v42 = vcombine.low %v96_v33, %v98_v34  ;;  %v99_v5 = vld [vmem:[#allocation5 + $0xec] sm:$0xf]  ;;  %v1190_v24 = vmov 0  }
  0x36   :  { %978 = vmatpush3.bf16.msra.mxu0 %v875_v11  ;;  %v872_v36 = vcombine.low %v72_v30, %v73_v32  ;;  %v70_v37 = vld [vmem:[#allocation5 + $0x40] sm:$0xf]  ;;  %v94_v41 = vld [vmem:[#allocation5 + $0xa4] sm:$0xff]  ;;  %v889_v6 = vcombine.low %v97_v4, %v99_v5  ;;  %v93_v7 = vld [vmem:[#allocation5 + $0x8c] sm:$0xf]  ;;  %442 = vmatprep.mubr.bf16.mxu1 %v1190_v24 }
  0x37   :  { %979 = vmatprep.subr.bf16.mxu0 %v1188_v0  ;;  %v71_v39 = vld [vmem:[#allocation5 + $0x60] sm:$0xf]  ;;  %v885_v45 = vcombine.high %v92_v40, %v94_v41  ;;  %v88_v47 = vld [vmem:[#allocation5 + $0x44] sm:$0xff]  ;;  %v884_v49 = vcombine.low %v92_v40, %v94_v41  ;;  %v95_v8 = vld [vmem:[#allocation5 + $0xac] sm:$0xf] }
  0x38   :  { %415 = vmatpush1.bf16.msra.mxu1 %v893_v28  ;;  %v871_v43 = vcombine.low %v70_v37, %v71_v39  ;;  %v68_v44 = vld [vmem:[#allocation5] sm:$0xf]  ;;  %v90_v48 = vld [vmem:[#allocation5 + $0x64] sm:$0xff]  ;;  %v886_v9 = vcombine.low %v93_v7, %v95_v8  ;;  %v89_v10 = vld [vmem:[#allocation5 + $0x4c] sm:$0xf] }
  0x39   :  { %416 = vmatprep.subr.bf16.mxu1 %v891_v31  ;;  %v69_v46 = vld [vmem:[#allocation5 + $0x20] sm:$0xf]  ;;  %v882_v52 = vcombine.high %v88_v47, %v90_v48  ;;  %v881_v56 = vcombine.low %v88_v47, %v90_v48  ;;  %v91_v11 = vld [vmem:[#allocation5 + $0x6c] sm:$0xf]  ;;  %v84_v13 = vld [vmem:[#allocation5 + $0x4] sm:$0xff] }
  0x3a   :  { %980 = vmatpush3.bf16.msra.mxu0 %v874_v22  ;;  %v870_v50 = vcombine.low %v68_v44, %v69_v46  ;;  %v883_v12 = vcombine.low %v89_v10, %v91_v11  ;;  %v86_v14 = vld [vmem:[#allocation5 + $0x24] sm:$0xff]  ;;  %v85_v17 = vld [vmem:[#allocation5 + $0xc] sm:$0xf]  ;;  %v144_v20 = vld [vmem:[#allocation5 + $0x1d0] sm:$0xff] }
  0x3b   :  { %981 = vmatprep.subr.bf16.mxu0 %v1188_v0  ;;  %v879_v15 = vcombine.high %v84_v13, %v86_v14  ;;  %v878_v16 = vcombine.low %v84_v13, %v86_v14  ;;  %v87_v18 = vld [vmem:[#allocation5 + $0x2c] sm:$0xf]  ;;  %v146_v21 = vld [vmem:[#allocation5 + $0x1f0] sm:$0xff]  ;;  %v869_v25 = vld [vmem:[#allocation7] ss:$0 sm:$0xff] }
  0x3c   :  { %417 = vmatpush1.bf16.msra.mxu1 %v890_v35  ;;  %v880_v19 = vcombine.low %v85_v17, %v87_v18  ;;  %v924_v22 = vcombine.high %v144_v20, %v146_v21  ;;  %v923_v23 = vcombine.low %v144_v20, %v146_v21  ;;  %v145_v28 = vld [vmem:[#allocation5 + $0x1d8] sm:$0xf]  ;;  %v140_v31 = vld [vmem:[#allocation5 + $0x190] sm:$0xff] }
  0x3d   :  { %418 = vmatprep.subr.bf16.mxu1 %v888_v38  ;;  %v142_v32 = vld [vmem:[#allocation5 + $0x1b0] sm:$0xff]  ;;  %v141_v38 = vld [vmem:[#allocation5 + $0x198] sm:$0xf] }
  0x3e   :  { %982 = vmatpush3.bf16.msra.mxu0 %v873_v29  ;;  %v147_v29 = vld [vmem:[#allocation5 + $0x1f8] sm:$0xf]  ;;  %v921_v37 = vcombine.high %v140_v31, %v142_v32  ;;  %v136_v41 = vld [vmem:[#allocation5 + $0x150] sm:$0xff] }
  0x3f   :  { %983 = vmatprep.subr.bf16.mxu0 %v1188_v0  ;;  %v925_v35 = vcombine.low %v145_v28, %v147_v29  ;;  %v143_v39 = vld [vmem:[#allocation5 + $0x1b8] sm:$0xf]  ;;  %v132_v48 = vld [vmem:[#allocation5 + $0x110] sm:$0xff]  ;;  %v161_v28 = vld [vmem:[#allocation5 + $0x1bc] sm:$0xf] }
  0x40   :  { %419 = vmatpush1.bf16.msra.mxu1 %v887_v42  ;;  %v138_v42 = vld [vmem:[#allocation5 + $0x170] sm:$0xff]  ;;  %v922_v44 = vcombine.low %v141_v38, %v143_v39  ;;  %v137_v46 = vld [vmem:[#allocation5 + $0x158] sm:$0xf]  ;;  %v152_v39 = vld [vmem:[#allocation5 + $0x9c] sm:$0xf] }
  0x41   :  { %420 = vmatprep.subr.bf16.mxu1 %v885_v45  ;;  %v918_v45 = vcombine.high %v136_v41, %v138_v42  ;;  %v139_v47 = vld [vmem:[#allocation5 + $0x178] sm:$0xf]  ;;  %v124_v62 = vld [vmem:[#allocation5 + $0x90] sm:$0xff] }
  0x42   :  { %984 = vmatpush3.bf16.msra.mxu0 %v872_v36  ;;  %v919_v51 = vcombine.low %v137_v46, %v139_v47  ;;  %v133_v53 = vld [vmem:[#allocation5 + $0x118] sm:$0xf]  ;;  %v122_v7 = vld [vmem:[#allocation5 + $0x70] sm:$0xff]  ;;  %v149_v46 = vld [vmem:[#allocation5 + $0x3c] sm:$0xf] }
  0x43   :  { %985 = vmatprep.subr.bf16.mxu0 %v1188_v0  ;;  %v135_v54 = vld [vmem:[#allocation5 + $0x138] sm:$0xf]  ;;  %v116_v13 = vld [vmem:[#allocation5 + $0x10] sm:$0xff] }
  0x44   :  { %421 = vmatpush1.bf16.msra.mxu1 %v884_v49  ;;  %v134_v49 = vld [vmem:[#allocation5 + $0x130] sm:$0xff]  ;;  %v916_v58 = vcombine.low %v133_v53, %v135_v54  ;;  %v131_v61 = vld [vmem:[#allocation5 + $0xf8] sm:$0xf] }
  0x45   :  { %422 = vmatprep.subr.bf16.mxu1 %v882_v52  ;;  %v915_v52 = vcombine.high %v132_v48, %v134_v49  ;;  %v125_v4 = vld [vmem:[#allocation5 + $0x98] sm:$0xf]  ;;  %v118_v14 = vld [vmem:[#allocation5 + $0x30] sm:$0xff] }
  0x46   :  { %986 = vmatpush3.bf16.msra.mxu0 %v871_v43  ;;  %v920_v43 = vcombine.low %v140_v31, %v142_v32  ;;  %v127_v5 = vld [vmem:[#allocation5 + $0xb8] sm:$0xf]  ;;  %v903_v17 = vcombine.high %v116_v13, %v118_v14  ;;  %v902_v20 = vcombine.low %v116_v13, %v118_v14  ;;  %v159_v31 = vld [vmem:[#allocation5 + $0x17c] sm:$0xf] }
  0x47   :  { %987 = vmatprep.subr.bf16.mxu0 %v1188_v0  ;;  %v121_v11 = vld [vmem:[#allocation5 + $0x58] sm:$0xf] }
  0x48   :  { %423 = vmatpush1.bf16.msra.mxu1 %v881_v56  ;;  %v130_v56 = vld [vmem:[#allocation5 + $0xf0] sm:$0xff]  ;;  %v117_v18 = vld [vmem:[#allocation5 + $0x18] sm:$0xf] }
  0x49   :  { %424 = vmatprep.subr.bf16.mxu1 %v879_v15  ;;  %v1268_v21 = vld [vmem:[#allocation2] sm:$0xff] }
  0x4a   :  { %988 = vmatpush3.bf16.msra.mxu0 %v870_v50  ;;  %v917_v50 = vcombine.low %v136_v41, %v138_v42  ;;  %v150_v42 = vld [vmem:[#allocation5 + $0x5c] sm:$0xf] }
  0x4b   :  { %993 = vmatprep.subr.bf16.mxu0 %v1188_v0 }
  0x4c   :  { %425 = vmatpush1.bf16.msra.mxu1 %v878_v16 }
  0x4d   :  { %990 = vmatmul.mubr.bf16.vlgmr.msra.gmra.mxu0 %v169_v55  ;;  %636 = vmatprep.subr.bf16.mxu1 %v924_v22  ;;  %v128_v55 = vld [vmem:[#allocation5 + $0xd0] sm:$0xff] }
  0x4e   :  { %994 = vmatpush3.bf16.msra.mxu0 %v901_v57  ;;  %1009 = vmatprep.mubr.msk.bf16.mxu0 %vm1189_vm0, %v1188_v0  ;;  %v914_v57 = vcombine.low %v132_v48, %v134_v49  ;;  %v912_v59 = vcombine.high %v128_v55, %v130_v56  ;;  %v911_v1 = vcombine.low %v128_v55, %v130_v56  ;;  %v267_v56 = vlaneseq }
  0x4f   :  { %995 = vmatprep.subr.bf16.mxu0 %v1188_v0 }
  0x52   :  { %996 = vmatpush3.bf16.msra.mxu0 %v898_v60  ;;  %v129_v60 = vld [vmem:[#allocation5 + $0xd8] sm:$0xf] }
  0x53   :  { %997 = vmatprep.subr.bf16.mxu0 %v1188_v0  ;;  %v913_v2 = vcombine.low %v129_v60, %v131_v61  ;;  %v166_v60 = vld [vmem:[#allocation7 + $0x4] sm:$0x7] }
  0x56   :  { %998 = vmatpush3.bf16.msra.mxu0 %v895_v63  ;;  %v126_v63 = vld [vmem:[#allocation5 + $0xb0] sm:$0xff] }
  0x57   :  { %999 = vmatprep.subr.bf16.mxu0 %v1188_v0  ;;  %v908_v8 = vcombine.low %v124_v62, %v126_v63 }
  0x5a   :  { %1000 = vmatpush3.bf16.msra.mxu0 %v892_v3  ;;  %v909_v3 = vcombine.high %v124_v62, %v126_v63 }
  0x5b   :  { %1001 = vmatprep.subr.bf16.mxu0 %v1188_v0 }
  0x5e   :  { %1002 = vmatpush3.bf16.msra.mxu0 %v889_v6  ;;  %v120_v6 = vld [vmem:[#allocation5 + $0x50] sm:$0xff] }
  0x5f   :  { %1003 = vmatprep.subr.bf16.mxu0 %v1188_v0  ;;  %v906_v10 = vcombine.high %v120_v6, %v122_v7  ;;  %v905_v15 = vcombine.low %v120_v6, %v122_v7 }
  0x62   :  { %1004 = vmatpush3.bf16.msra.mxu0 %v886_v9  ;;  %v910_v9 = vcombine.low %v125_v4, %v127_v5 }
  0x63   :  { %1005 = vmatprep.subr.bf16.mxu0 %v1188_v0 }
  0x66   :  { %1006 = vmatpush3.bf16.msra.mxu0 %v883_v12  ;;  %v123_v12 = vld [vmem:[#allocation5 + $0x78] sm:$0xf] }
  0x67   :  { %1007 = vmatprep.subr.bf16.mxu0 %v1188_v0  ;;  %v907_v16 = vcombine.low %v121_v11, %v123_v12 }
  0x6a   :  { %1008 = vmatpush3.bf16.msra.mxu0 %v880_v19  ;;  %v119_v19 = vld [vmem:[#allocation5 + $0x38] sm:$0xf] }
  0x6b   :  { %1013 = vmatprep.subr.bf16.mxu0 %v1188_v0  ;;  %v904_v22 = vcombine.low %v117_v18, %v119_v19 }
 0x10d   :  { %v258_v26 = vpop.f32.mrf.mxu0 }
 0x10e   :  { %v259_v27 = vadd.f32 %v869_v25, %v258_v26  ;;  %v163_v25 = vld [vmem:[#allocation5 + $0x1fc] sm:$0xf] }
 0x10f   :  { %v991_v30 = vpop.f32.mrf.mxu0 }
 0x110   :  { %v264_v33 = vmax.f32 %v259_v27, 0.0  ;;  %v160_v27 = vld [vmem:[#allocation5 + $0x19c] sm:$0xf] }
 0x111   :  { %v261_v34 = vpop.f32.mrf.mxu0  ;;  %v935_v29 = vcombine.low %v160_v27, %v161_v28  ;;  %v158_v30 = vld [vmem:[#allocation5 + $0x15c] sm:$0xf] }
 0x112   :  { %v265_v36 = vpack.c.bf16 %v264_v33, %v264_v33  ;;  %v934_v32 = vcombine.low %v158_v30, %v159_v31  ;;  %v156_v33 = vld [vmem:[#allocation5 + $0x11c] sm:$0xf] }
 0x113   :  { %v992_v40 = vpop.f32.mrf.mxu0  ;;  %v157_v34 = vld [vmem:[#allocation5 + $0x13c] sm:$0xf] }
 0x114   :  { %443 = vmatmul.mubr.bf16.vlgmr.msra.gmra.mxu1 %v265_v36  ;;  %1010 = vmatmul.mubr.bf16.vlgmr.msra.gmra.mxu0 %v265_v36  ;;  %v154_v36 = vld [vmem:[#allocation5 + $0xdc] sm:$0xf] }
 0x115   :  { %637 = vmatpush1.bf16.msra.mxu1 %v923_v23  ;;  %1014 = vmatpush3.bf16.msra.mxu0 %v925_v35  ;;  %v491_v23 = vpack.c.bf16 %v1268_v21, %v1268_v21  ;;  %v933_v35 = vcombine.low %v156_v33, %v157_v34  ;;  %v153_v40 = vld [vmem:[#allocation5 + $0xbc] sm:$0xf] }
 0x116   :  { %638 = vmatprep.subr.bf16.mxu1 %v921_v37  ;;  %668 = vmatprep.mubr.bf16.mxu1 %v1190_v24  ;;  %v162_v24 = vld [vmem:[#allocation5 + $0x1dc] sm:$0xf]  ;;  %v931_v41 = vcombine.low %v152_v39, %v153_v40 }
 0x117   :  { %1015 = vmatprep.subr.bf16.mxu0 %v1188_v0  ;;  %1029 = vmatprep.mubr.msk.bf16.mxu0 %vm1189_vm0, %v1188_v0  ;;  %v936_v26 = vcombine.low %v162_v24, %v163_v25  ;;  %v155_v37 = vld [vmem:[#allocation5 + $0xfc] sm:$0xf] }
 0x118   :  { %v932_v38 = vcombine.low %v154_v36, %v155_v37 }
 0x119   :  { %639 = vmatpush1.bf16.msra.mxu1 %v920_v43  ;;  %1016 = vmatpush3.bf16.msra.mxu0 %v922_v44  ;;  %v151_v43 = vld [vmem:[#allocation5 + $0x7c] sm:$0xf] }
 0x11a   :  { %640 = vmatprep.subr.bf16.mxu1 %v918_v45  ;;  %1017 = vmatprep.subr.bf16.mxu0 %v1188_v0  ;;  %v930_v44 = vcombine.low %v150_v42, %v151_v43  ;;  %v148_v45 = vld [vmem:[#allocation5 + $0x1c] sm:$0xf] }
 0x11b   :  { %v929_v47 = vcombine.low %v148_v45, %v149_v46 }
 0x11d   :  { %641 = vmatpush1.bf16.msra.mxu1 %v917_v50  ;;  %1018 = vmatpush3.bf16.msra.mxu0 %v919_v51 }
 0x11e   :  { %642 = vmatprep.subr.bf16.mxu1 %v915_v52  ;;  %1019 = vmatprep.subr.bf16.mxu0 %v1188_v0 }
 0x121   :  { %643 = vmatpush1.bf16.msra.mxu1 %v914_v57  ;;  %1020 = vmatpush3.bf16.msra.mxu0 %v916_v58  ;;  %v268_v57 = vshrl.u32 %v267_v56, 7 }
 0x122   :  { %644 = vmatprep.subr.bf16.mxu1 %v912_v59  ;;  %1021 = vmatprep.subr.bf16.mxu0 %v1188_v0  ;;  %v165_v59 = vld [vmem:[#allocation7 + $0x1] sm:$0x7] }
 0x123   :  { %v269_v58 = vsub.s32 0, %v268_v57  ;;  %v273_v63 = vsub.s32 1, %v268_v57 }
 0x125   :  { %645 = vmatpush1.bf16.msra.mxu1 %v911_v1  ;;  %1022 = vmatpush3.bf16.msra.mxu0 %v913_v2  ;;  %v270_v61 = vrot.slane %v165_v59, %v269_v58  ;;  %v496_v62 = vrot.slane %v166_v60, %v269_v58  ;;  %v500_v4 = vrot.slane %v166_v60, %v273_v63 }
 0x126   :  { %646 = vmatprep.subr.bf16.mxu1 %v909_v3  ;;  %1023 = vmatprep.subr.bf16.mxu0 %v1188_v0  ;;  %v274_v7 = vrot.slane %v165_v59, %v273_v63 }
 0x129   :  { %647 = vmatpush1.bf16.msra.mxu1 %v908_v8  ;;  %1024 = vmatpush3.bf16.msra.mxu0 %v910_v9 }
 0x12a   :  { %648 = vmatprep.subr.bf16.mxu1 %v906_v10  ;;  %1025 = vmatprep.subr.bf16.mxu0 %v1188_v0 }
 0x12d   :  { %649 = vmatpush1.bf16.msra.mxu1 %v905_v15  ;;  %1026 = vmatpush3.bf16.msra.mxu0 %v907_v16 }
 0x12e   :  { %650 = vmatprep.subr.bf16.mxu1 %v903_v17  ;;  %1027 = vmatprep.subr.bf16.mxu0 %v1188_v0 }
 0x131   :  { %651 = vmatpush1.bf16.msra.mxu1 %v902_v20  ;;  %1028 = vmatpush3.bf16.msra.mxu0 %v904_v22  ;;  %v277_v20 = vsub.s32 2, %v268_v57 }
 0x132   :  { %1033 = vmatprep.subr.bf16.mxu1 %v1188_v0 }
 0x133   :  { %v504_v22 = vrot.slane %v166_v60, %v277_v20  ;;  %v278_v24 = vrot.slane %v165_v59, %v277_v20 }
 0x134   :  { %669 = vmatmul.mubr.bf16.vlgmr.msra.gmra.mxu1 %v491_v23  ;;  %1030 = vmatmul.mubr.bf16.vlgmr.msra.gmra.mxu0 %v491_v23 }
 0x135   :  { %1049 = vmatprep.mubr.msk.bf16.mxu1 %vm1189_vm0, %v1188_v0  ;;  %1034 = vmatpush3.bf16.msra.mxu1 %v936_v26 }
 0x136   :  { %1035 = vmatprep.subr.bf16.mxu1 %v1188_v0 }
 0x139   :  { %1036 = vmatpush3.bf16.msra.mxu1 %v935_v29 }
 0x13a   :  { %1037 = vmatprep.subr.bf16.mxu1 %v1188_v0 }
 0x13d   :  { %1038 = vmatpush3.bf16.msra.mxu1 %v934_v32 }
 0x13e   :  { %1039 = vmatprep.subr.bf16.mxu1 %v1188_v0 }
 0x141   :  { %1040 = vmatpush3.bf16.msra.mxu1 %v933_v35 }
 0x142   :  { %1041 = vmatprep.subr.bf16.mxu1 %v1188_v0 }
 0x145   :  { %1042 = vmatpush3.bf16.msra.mxu1 %v932_v38  ;;  %v928_v38 = vld [vmem:[#allocation7 + $0x7] ss:$0 sm:$0xff] }
 0x146   :  { %1043 = vmatprep.subr.bf16.mxu1 %v1188_v0 }
 0x149   :  { %1044 = vmatpush3.bf16.msra.mxu1 %v931_v41 }
 0x14a   :  { %1045 = vmatprep.subr.bf16.mxu1 %v1188_v0 }
 0x14d   :  { %1046 = vmatpush3.bf16.msra.mxu1 %v930_v44 }
 0x14e   :  { %1047 = vmatprep.subr.bf16.mxu1 %v1188_v0 }
 0x151   :  { %1048 = vmatpush3.bf16.msra.mxu1 %v929_v47 }
 0x1d4   :  { %v444_v48 = vpop.f32.mrf.mxu1  ;;  %v485_v49 = vpop.f32.mrf.mxu0 }
 0x1d5   :  { %v445_v0 = vadd.f32 %v444_v48, %v270_v61  ;;  %v486_v28 = vadd.f32 %v485_v49, %v278_v24 }
 0x1d6   :  { %v446_v50 = vpop.f32.mrf.mxu1  ;;  %v1011_v51 = vpop.f32.mrf.mxu0 }
 0x1d7   :  { %v447_v15 = vadd.f32 %v446_v50, %v274_v7 }
 0x1d8   :  { %v448_v52 = vpop.f32.mrf.mxu1  ;;  %v488_v53 = vpop.f32.mrf.mxu0 }
 0x1da   :  { %v449_v54 = vpop.f32.mrf.mxu1  ;;  %v1012_v55 = vpop.f32.mrf.mxu0 }
 0x1f4   :  { %v670_v1 = vpop.f32.mrf.mxu1  ;;  %v711_v2 = vpop.f32.mrf.mxu0 }
 0x1f5   :  { %v671_v3 = vadd.f32 %v670_v1, %v496_v62  ;;  %v712_v26 = vadd.f32 %v711_v2, %v504_v22 }
 0x1f6   :  { %v672_v5 = vpop.f32.mrf.mxu1  ;;  %v1031_v6 = vpop.f32.mrf.mxu0 }
 0x1f7   :  { %v717_v8 = vadd.f32 %v671_v3, %v445_v0  ;;  %v673_v12 = vadd.f32 %v672_v5, %v500_v4 }
 0x1f8   :  { %v674_v9 = vpop.f32.mrf.mxu1  ;;  %v714_v10 = vpop.f32.mrf.mxu0 }
 0x1f9   :  { %v926_v11 = vmul.f32 -1.442695, %v717_v8  ;;  %v724_v16 = vadd.f32 %v673_v12, %v447_v15 }
 0x1fa   :  { %v675_v13 = vpop.f32.mrf.mxu1  ;;  %v1032_v14 = vpop.f32.mrf.mxu0 }
 0x1fb   :  { %1064 = vpow2.f32 %v926_v11  ;;  %v927_v17 = vmul.f32 -1.442695, %v724_v16 }
 0x1fd   :  { %1066 = vpow2.f32 %v927_v17 }
 0x208   :  { %v1065_v18 = vpop.eup %1064 }
 0x209   :  { %v721_v19 = vadd.f32 1.0, %v1065_v18 }
 0x20a   :  { %v1067_v23 = vpop.eup %1066 }
 0x20b   :  { %1068 = vrcp.f32 %v721_v19  ;;  %v728_v25 = vadd.f32 1.0, %v1067_v23 }
 0x20d   :  { %1070 = vrcp.f32 %v728_v25 }
 0x218   :  { %v1069_v27 = vpop.eup %1068 }
 0x219   :  { %v731_v29 = vmul.f32 %v1069_v27, %v712_v26 }
 0x21a   :  { %v1071_v31 = vpop.eup %1070 }
 0x21b   :  { %v732_v30 = vadd.f32 %v731_v29, %v486_v28  ;;  %v734_v32 = vsub.f32 1.0, %v1071_v31  ;;  %v736_v35 = vmul.f32 %v1071_v31, %v1268_v21 }
 0x21d   :  { %1072 = vtanh.f32 %v732_v30 }
 0x22a   :  { %v1073_v33 = vpop.eup %1072 }
 0x22b   :  { %v735_v34 = vmul.f32 %v1073_v33, %v734_v32 }
 0x22d   :  { %v737_v36 = vadd.f32 %v736_v35, %v735_v34 }
 0x22f   :  { %v738_v37 = vpack.c.bf16 %v737_v36, %v737_v36  ;;  %834 = vst [vmem:[#allocation9] sm:$0xff] %v737_v36 }
 0x231   :  { %1050 = vmatmul.mubr.bf16.vlgmr.msra.gmra.mxu1 %v738_v37 }
 0x2f1   :  { %v827_v39 = vpop.f32.mrf.mxu1 }
 0x2f2   :  { %v828_v40 = vadd.f32 %v928_v38, %v827_v39 }
 0x2f3   :  { %v1051_v41 = vpop.f32.mrf.mxu1 }
 0x2f4   :  { %833 = vst [vmem:[#allocation8] sm:$0xff] %v828_v40 }
 0x2f5   :  { %v830_v42 = vpop.f32.mrf.mxu1 }
 0x2f7   :  { %v1052_v43 = vpop.f32.mrf.mxu1 }
 0x2f8   :  { %839 = vsyncadd [#allocation4], 96  ;;  %s1191_s0 = smov [#allocation8]  }
 0x2f9   :  { %s840_s11 = sshll.u32 %s1191_s0, 4  ;;  %s841_s11 = int_to_ptr.vmem [resolvable:$true] %s840_s11 }
 0x2fa   :  { %s1134_s12 = scalar_lea.vmem %s841_s11, 32  ;;  %s1138_s13 = scalar_lea.vmem %s841_s11, 128 }
 0x2fb   :  { %p1135_p1 = scmp.ne.s32.totalorder %s841_s11, %s1134_s12  ;;  %p1139_p2 = scmp.lt.s32.totalorder %s841_s11, %s841_s11 }
 0x2fc   :  { %p1140_p3 = scmp.lt.s32.totalorder %s1138_s13, %s1134_s12 }
 0x2fe   :  { %p1141_p4 = por %p1140_p3, %p1139_p2 }
 0x300   :  { %p1142_p5 = pnand %p1141_p4, %p1135_p1 }
 0x302   :  { %1145 = shalt.err (!%p1142_p5)
}
 0x303   :  { %846 = dma.vmem_to_hbm [thread:$0]  %s841_s11, 32, %s1300_s4, [#allocation4], %s1184_s22, %s1184_s22, %s1186_s29  }
 0x304   :  { %851 = vsyncadd [#allocation10], 96  ;;  %s1192_s16 = smov [#allocation9]  }
 0x305   :  { %s852_s17 = sshll.u32 %s1192_s16, 4  ;;  %s853_s17 = int_to_ptr.vmem [resolvable:$true] %s852_s17 }
 0x306   :  { %s1154_s18 = scalar_lea.vmem %s853_s17, 32  ;;  %s1158_s19 = scalar_lea.vmem %s853_s17, 128 }
 0x307   :  { %p1155_p6 = scmp.ne.s32.totalorder %s853_s17, %s1154_s18  ;;  %p1159_p7 = scmp.lt.s32.totalorder %s853_s17, %s853_s17 }
 0x308   :  { %p1160_p8 = scmp.lt.s32.totalorder %s1158_s19, %s1154_s18 }
 0x30a   :  { %p1161_p9 = por %p1160_p8, %p1159_p7 }
 0x30c   :  { %p1162_p10 = pnand %p1161_p9, %p1155_p6 }
 0x30e   :  { %1165 = shalt.err (!%p1162_p10)
}
 0x30f   :  { %858 = dma.vmem_to_hbm [thread:$0]  %s853_s17, 32, %s1301_s5, [#allocation10], %s1184_s22, %s1184_s22, %s1186_s29  }
 0x310   :  { %1178 = dma.done.wait [#allocation4], 128  }
 0x311   :  { %1179 = vsyncadd [#allocation4], 4294967168 }
 0x312   :  { %1180 = dma.done.wait [#allocation10], 128  }
 0x313   :  { %1181 = vsyncadd [#allocation10], 4294967168 }
 0x314   :  { %865 = vsyncpa [#allocation3], 1 }
 0x315   :  { %866 = vsyncpa [#allocation6], 1 }
 0x316   :  { %867 = vsyncpa [#allocation4], 1 }
 0x317   :  { %868 = vsyncpa [#allocation10], 1 }

</bundles_post_ra>
